<compile_context>
chip_gen: v7x
topology: tpu7x:2x2x1
jax: 0.10.0
libtpu: 0.0.40
codegen_flags: <defaults>
</compile_context>

<pallas_src>
import numpy as np
import jax
import jax.numpy as jnp
from jax import lax
from jax.experimental import pallas as pl
from jax.experimental.pallas import tpu as pltpu

INPUT_SIZE = 16
HIDDEN_SIZE = 32
BRANCH = 4          # power of two AND BRANCH*HIDDEN_SIZE == 128 (roll-tree branch sum)
SEQ = 8
BATCH = 2


def dh_rnn_kernel(x_ref, pA_ref, pB_ref, out_ref, drive_ref, mem1_ref):
    T, Bp, H = out_ref.shape
    _, I = x_ref.shape
    BH = pA_ref.shape[-1]            # BRANCH * H (lane-fused branch dimension)

    # ---- unpack the two coalesced parameter slabs (static, 8-row-aligned slices) ----
    r_b1 = I + H
    r_taun = r_b1 + 8
    r_w2 = 8
    r_b2 = r_w2 + H
    r_taum2 = r_b2 + 8
    w_in = pA_ref[0:I, :]                    # (I, BH)
    w_rec = pA_ref[I:I + H, :]               # (H, BH)
    b1 = pA_ref[r_b1:r_b1 + 1, :]            # (1, BH)
    tau_n = pA_ref[r_taun:r_taun + 1, :]     # (1, BH)
    tau_m1 = pB_ref[0:1, :]                  # (1, H)
    w2 = pB_ref[r_w2:r_w2 + H, :]            # (H, H)
    b2 = pB_ref[r_b2:r_b2 + 1, :]            # (1, H)
    tau_m2 = pB_ref[r_taum2:r_taum2 + 1, :]  # (1, H)

    # ---- time-invariant gates; fold (1 - sigmoid) into weights / staged drive ----
    beta = jax.nn.sigmoid(tau_n)             # (1, BH)
    omb = 1.0 - beta
    beta_b = jnp.broadcast_to(beta, (Bp, BH))
    w_rec_s = w_rec * omb                    # column-scaled recurrent weight
    a1 = jax.nn.sigmoid(tau_m1)
    a1_b = jnp.broadcast_to(a1, (Bp, H))
    oma1_b = 1.0 - a1_b
    a2 = jax.nn.sigmoid(tau_m2)
    a2_b = jnp.broadcast_to(a2, (Bp, H))
    oma2 = 1.0 - a2
    w2_s = w2 * oma2                         # fold readout gate into dense weight/bias
    b2_s = b2 * oma2

    # ---- feed-forward branch drive for ALL time steps: one lane-dense matmul ----
    drive_ref[...] = (jnp.dot(x_ref[...], w_in,
                              preferred_element_type=jnp.float32) + b1) * omb

    # ---- serial layer-1 recurrence (the only truly sequential part) ----
    def step1(t, carry):
        mem1, d = carry
        row = pl.multiple_of(t * Bp, Bp)
        d = beta_b * d + (drive_ref[pl.ds(row, Bp), :] +
                          jnp.dot(mem1, w_rec_s, preferred_element_type=jnp.float32))
        # sum over branches stacked on the lane axis: log-tree of XLU rotations
        s = d
        shift = BH // 2
        while shift >= H:                    # trace-time loop (BRANCH is a power of two)
            s = s + pltpu.roll(s, shift=shift, axis=1)
            shift //= 2
        mem1 = a1_b * mem1 + oma1_b * s[:, :H]   # "nospike": membrane is forwarded
        mem1_ref[pl.ds(row, Bp), :] = mem1
        return (mem1, d)

    z_h = jnp.zeros((Bp, H), jnp.float32)
    z_d = jnp.zeros((Bp, BH), jnp.float32)
    lax.fori_loop(0, T, step1, (z_h, z_d), unroll=True)

    # ---- layer-2 dense, hoisted out of the serial loop: one matmul for all t ----
    mem1_ref[...] = (jnp.dot(mem1_ref[...], w2_s,
                             preferred_element_type=jnp.float32) + b2_s)

    # ---- cheap leaky-integrator scan for the readout (gate already folded in) ----
    def step2(t, mem2):
        row = pl.multiple_of(t * Bp, Bp)
        mem2 = a2_b * mem2 + mem1_ref[pl.ds(row, Bp), :]
        out_ref[t] = mem2
        return mem2

    lax.fori_loop(0, T, step2, z_h, unroll=True)


def dh_rnn_forward(x_btI, params):
    """batch_first forward: x (B, T, I) -> (output (B, T, H), h_n (B, H))."""
    w1, b1, tau_n, tau_m1, w2, b2, tau_m2 = params
    B, T, I = x_btI.shape
    H, BR = HIDDEN_SIZE, BRANCH
    BH = BR * H
    assert BR & (BR - 1) == 0, "branch count must be a power of two (roll-tree sum)"
    assert BH == 128, "roll-tree branch sum assumes BRANCH*H fills one 128-lane vreg"
    assert I % 8 == 0 and H % 8 == 0, "parameter-slab row offsets must be sublane-aligned"
    Bp = ((B + 7) // 8) * 8          # pad batch to the f32 sublane granule

    # time-major, batch-padded, flattened to a lane-aligned 2-D slab (T*Bp, I)
    x_tm = jnp.transpose(x_btI, (1, 0, 2))
    x_tm = jnp.pad(x_tm, ((0, 0), (0, Bp - B), (0, 0)))
    x2d = x_tm.reshape(T * Bp, I)

    # fuse the branch dimension onto the lane axis: branch j -> lanes [j*H, (j+1)*H)
    w_in_f = jnp.transpose(w1[:, :I, :], (1, 0, 2)).reshape(I, BH)     # (I, BR*H)
    w_rec_f = jnp.transpose(w1[:, I:, :], (1, 0, 2)).reshape(H, BH)    # (H, BR*H)
    b1_f = jnp.transpose(b1, (1, 0, 2)).reshape(1, BH)
    tau_n_f = jnp.transpose(tau_n, (1, 0, 2)).reshape(1, BH)

    # coalesce the 9 tiny parameters into 2 sublane-aligned slabs (2 DMAs instead of 9)
    zpad_bh = jnp.zeros((7, BH), jnp.float32)
    pA = jnp.concatenate([w_in_f, w_rec_f, b1_f, zpad_bh, tau_n_f, zpad_bh], axis=0)
    zpad_h = jnp.zeros((7, H), jnp.float32)
    pB = jnp.concatenate([tau_m1, zpad_h, w2, b2, zpad_h, tau_m2, zpad_h], axis=0)

    flops = (2 * T * Bp * I * BH          # feed-forward drive matmul
             + T * 2 * Bp * H * BH        # per-step recurrent matmuls
             + 2 * T * Bp * H * H         # layer-2 dense matmul
             + 8 * T * Bp * BH)           # elementwise scans (approx)
    bytes_accessed = 4 * (x2d.size + pA.size + pB.size + T * Bp * H)
    cost = pl.CostEstimate(flops=int(flops), transcendentals=int(BH + 2 * H),
                           bytes_accessed=int(bytes_accessed))

    out_tm = pl.pallas_call(
        dh_rnn_kernel,
        out_shape=jax.ShapeDtypeStruct((T, Bp, H), jnp.float32),
        scratch_shapes=[
            pltpu.VMEM((T * Bp, BH), jnp.float32),   # branch drive, all time steps
            pltpu.VMEM((T * Bp, H), jnp.float32),    # mem1 (then readout drive), all steps
        ],
        cost_estimate=cost,
    )(x2d, pA, pB)

    out = jnp.transpose(out_tm[:, :B, :], (1, 0, 2))   # back to batch_first
    # PyTorch DH_RNN sets h_n = mem_layer2 at the last time step
    h_n = out_tm[-1, :B, :]
    return out, h_n


def init_params(key):
    I, H, BR = INPUT_SIZE, HIDDEN_SIZE, BRANCH
    K = I + H                      # I + H divisible by BR -> no padding needed
    keys = jax.random.split(key, 6)

    # layer-1 dense (PyTorch nn.Linear(K, H*BR) default uniform init), then branch mask.
    bound = 1.0 / float(np.sqrt(K))
    w1_pt = jax.random.uniform(keys[0], (H * BR, K), minval=-bound, maxval=bound,
                               dtype=jnp.float32)
    b1_pt = jax.random.uniform(keys[1], (H * BR,), minval=-bound, maxval=bound,
                               dtype=jnp.float32)
    # Dendritic sparsity mask: per output neuron the K inputs are partitioned into
    # BR disjoint groups (deterministic permutation).
    rng = np.random.RandomState(0)
    mask = np.zeros((H * BR, K), np.float32)
    group = K // BR
    for h in range(H):
        perm = rng.permutation(K)
        for j in range(BR):
            mask[h * BR + j, perm[j * group:(j + 1) * group]] = 1.0
    w1_pt = w1_pt * jnp.asarray(mask)

    # Repack to kernel layout: w1[j] is the (K, H) weight of branch j.
    w1 = jnp.transpose(w1_pt.reshape(H, BR, K), (1, 2, 0))          # (BR, K, H)
    b1 = jnp.transpose(b1_pt.reshape(H, BR))[:, None, :]            # (BR, 1, H)

    tau_n = jax.random.uniform(keys[2], (BR, 1, H), minval=0.0, maxval=4.0,
                               dtype=jnp.float32)
    tau_m1 = jax.random.uniform(keys[3], (1, H), minval=0.0, maxval=4.0,
                                dtype=jnp.float32)

    # layer-2 readout: xavier_normal_ weight, zero bias (as in DH_RNN.__init__).
    std = float(np.sqrt(2.0 / (H + H)))
    w2 = std * jax.random.normal(keys[4], (H, H), dtype=jnp.float32)  # (in, out) layout
    b2 = jnp.zeros((1, H), jnp.float32)
    tau_m2 = jax.random.uniform(keys[5], (1, H), minval=0.0, maxval=4.0,
                                dtype=jnp.float32)
    return (w1, b1, tau_n, tau_m1, w2, b2, tau_m2)


def ref_forward(x_btI, params):
    """Pure-JAX reference of the same recurrence (for correctness check)."""
    w1, b1, tau_n, tau_m1, w2, b2, tau_m2 = params
    B, T, I = x_btI.shape
    H = HIDDEN_SIZE
    spk = jnp.zeros((B, H)); mem1 = jnp.zeros((B, H)); mem2 = jnp.zeros((B, H))
    d = jnp.zeros((BRANCH, B, H))
    outs = []
    for t in range(T):
        x = x_btI[:, t, :]
        l = jnp.zeros((B, H)); d_new = []
        for j in range(BRANCH):
            bi = x @ w1[j, :I] + spk @ w1[j, I:] + b1[j]
            beta = jax.nn.sigmoid(tau_n[j])
            dj = beta * d[j] + (1.0 - beta) * bi
            d_new.append(dj); l = l + dj
        d = jnp.stack(d_new)
        alpha1 = jax.nn.sigmoid(tau_m1)
        mem1 = alpha1 * mem1 + (1.0 - alpha1) * l
        spk = mem1
        alpha2 = jax.nn.sigmoid(tau_m2)
        mem2 = alpha2 * mem2 + (1.0 - alpha2) * (mem1 @ w2 + b2)
        outs.append(mem2)
    return jnp.stack(outs, axis=1), outs[-1]


if __name__ == "__main__":
    key = jax.random.PRNGKey(0)
    kx, kp = jax.random.split(key)
    x = jax.random.normal(kx, (BATCH, SEQ, INPUT_SIZE), dtype=jnp.float32)
    params = init_params(kp)

    out, h_n = dh_rnn_forward(x, params)
    out, h_n = jax.block_until_ready((out, h_n))

    out_ref, h_ref = ref_forward(x, params)
    assert out.shape == (BATCH, SEQ, HIDDEN_SIZE) and h_n.shape == (BATCH, HIDDEN_SIZE)
    np.testing.assert_allclose(np.asarray(out), np.asarray(out_ref), rtol=1e-4, atol=1e-4)
    np.testing.assert_allclose(np.asarray(h_n), np.asarray(h_ref), rtol=1e-4, atol=1e-4)
    print("KERNEL_OK")
</pallas_src>

<mosaic_0001>
module attributes {stable_mosaic.version = 11 : i64} {
  func.func @dh_rnn_kernel(%arg0: memref<64x16xf32, #tpu.memory_space<vmem>>, %arg1: memref<64x128xf32, #tpu.memory_space<vmem>>, %arg2: memref<56x32xf32, #tpu.memory_space<vmem>>, %arg3: memref<8x8x32xf32, #tpu.memory_space<vmem>>, %arg4: memref<64x128xf32, #tpu.memory_space<vmem>>, %arg5: memref<64x32xf32, #tpu.memory_space<vmem>>) attributes {dimension_semantics = [], scalar_prefetch = 0 : i64, scratch_operands = 2 : i64, tpu.core_type = #tpu.core_type<tc>} {
    %c0 = arith.constant 0 : index
    %c0_0 = arith.constant 0 : index
    %0 = vector.load %arg1[%c0, %c0_0] : memref<64x128xf32, #tpu.memory_space<vmem>>, vector<16x128xf32>
    %c16 = arith.constant 16 : index
    %c0_1 = arith.constant 0 : index
    %1 = vector.load %arg1[%c16, %c0_1] : memref<64x128xf32, #tpu.memory_space<vmem>>, vector<32x128xf32>
    %c48 = arith.constant 48 : index
    %c0_2 = arith.constant 0 : index
    %2 = vector.load %arg1[%c48, %c0_2] : memref<64x128xf32, #tpu.memory_space<vmem>>, vector<1x128xf32>
    %c56 = arith.constant 56 : index
    %c0_3 = arith.constant 0 : index
    %3 = vector.load %arg1[%c56, %c0_3] : memref<64x128xf32, #tpu.memory_space<vmem>>, vector<1x128xf32>
    %c0_4 = arith.constant 0 : index
    %c0_5 = arith.constant 0 : index
    %4 = vector.load %arg2[%c0_4, %c0_5] : memref<56x32xf32, #tpu.memory_space<vmem>>, vector<1x32xf32>
    %c8 = arith.constant 8 : index
    %c0_6 = arith.constant 0 : index
    %5 = vector.load %arg2[%c8, %c0_6] : memref<56x32xf32, #tpu.memory_space<vmem>>, vector<32x32xf32>
    %c40 = arith.constant 40 : index
    %c0_7 = arith.constant 0 : index
    %6 = vector.load %arg2[%c40, %c0_7] : memref<56x32xf32, #tpu.memory_space<vmem>>, vector<1x32xf32>
    %c48_8 = arith.constant 48 : index
    %c0_9 = arith.constant 0 : index
    %7 = vector.load %arg2[%c48_8, %c0_9] : memref<56x32xf32, #tpu.memory_space<vmem>>, vector<1x32xf32>
    %8 = arith.negf %3 : vector<1x128xf32>
    %9 = math.exp %8 : vector<1x128xf32>
    %cst = arith.constant 1.000000e+00 : f32
    %10 = vector.broadcast %cst : f32 to vector<1x128xf32>
    %11 = arith.addf %10, %9 : vector<1x128xf32>
    %12 = arith.divf %10, %11 : vector<1x128xf32>
    %cst_10 = arith.constant 1.000000e+00 : f32
    %13 = vector.broadcast %cst_10 : f32 to vector<1x128xf32>
    %14 = arith.subf %13, %12 : vector<1x128xf32>
    %15 = vector.shape_cast %12 : vector<1x128xf32> to vector<1x128xf32>
    %16 = vector.broadcast %15 : vector<1x128xf32> to vector<8x128xf32>
    %17 = vector.broadcast %14 : vector<1x128xf32> to vector<32x128xf32>
    %18 = arith.mulf %1, %17 : vector<32x128xf32>
    %19 = arith.negf %4 : vector<1x32xf32>
    %20 = math.exp %19 : vector<1x32xf32>
    %cst_11 = arith.constant 1.000000e+00 : f32
    %21 = vector.broadcast %cst_11 : f32 to vector<1x32xf32>
    %22 = arith.addf %21, %20 : vector<1x32xf32>
    %23 = arith.divf %21, %22 : vector<1x32xf32>
    %24 = vector.shape_cast %23 : vector<1x32xf32> to vector<1x32xf32>
    %25 = vector.broadcast %24 : vector<1x32xf32> to vector<8x32xf32>
    %cst_12 = arith.constant 1.000000e+00 : f32
    %26 = vector.broadcast %cst_12 : f32 to vector<8x32xf32>
    %27 = arith.subf %26, %25 : vector<8x32xf32>
    %28 = arith.negf %7 : vector<1x32xf32>
    %29 = math.exp %28 : vector<1x32xf32>
    %cst_13 = arith.constant 1.000000e+00 : f32
    %30 = vector.broadcast %cst_13 : f32 to vector<1x32xf32>
    %31 = arith.addf %30, %29 : vector<1x32xf32>
    %32 = arith.divf %30, %31 : vector<1x32xf32>
    %33 = vector.shape_cast %32 : vector<1x32xf32> to vector<1x32xf32>
    %34 = vector.broadcast %33 : vector<1x32xf32> to vector<8x32xf32>
    %cst_14 = arith.constant 1.000000e+00 : f32
    %35 = vector.broadcast %cst_14 : f32 to vector<1x32xf32>
    %36 = arith.subf %35, %32 : vector<1x32xf32>
    %37 = vector.broadcast %36 : vector<1x32xf32> to vector<32x32xf32>
    %38 = arith.mulf %5, %37 : vector<32x32xf32>
    %39 = arith.mulf %6, %36 : vector<1x32xf32>
    %c0_15 = arith.constant 0 : index
    %c0_16 = arith.constant 0 : index
    %40 = vector.load %arg0[%c0_15, %c0_16] : memref<64x16xf32, #tpu.memory_space<vmem>>, vector<64x16xf32>
    %cst_17 = arith.constant dense<0.000000e+00> : vector<64x128xf32>
    %41 = tpu.matmul %40, %0, %cst_17 {dimension_numbers = #tpu.dot_dimension_numbers<[1], [0], [0], [1], [0, 0, 1, 1], [], []>} : vector<64x16xf32>, vector<16x128xf32>, vector<64x128xf32> -> vector<64x128xf32>
    %42 = vector.broadcast %2 : vector<1x128xf32> to vector<64x128xf32>
    %43 = arith.addf %41, %42 : vector<64x128xf32>
    %44 = vector.broadcast %14 : vector<1x128xf32> to vector<64x128xf32>
    %45 = arith.mulf %43, %44 : vector<64x128xf32>
    %c0_18 = arith.constant 0 : index
    %c0_19 = arith.constant 0 : index
    %46 = vector.load %arg4[%c0_18, %c0_19] : memref<64x128xf32, #tpu.memory_space<vmem>>, vector<64x128xf32>
    tpu.vector_store %arg4[%c0_18, %c0_19], %45 {strides = array<i32>} : memref<64x128xf32, #tpu.memory_space<vmem>>, vector<64x128xf32>,
    %cst_20 = arith.constant 0.000000e+00 : f32
    %47 = vector.broadcast %cst_20 : f32 to vector<8x32xf32>
    %cst_21 = arith.constant 0.000000e+00 : f32
    %48 = vector.broadcast %cst_21 : f32 to vector<8x128xf32>
    %c0_i32 = arith.constant 0 : i32
    %c8_i32 = arith.constant 8 : i32
    %49 = arith.muli %c0_i32, %c8_i32 : i32
    %50 = tpu.assume_multiple %49, 8 : i32
    %51 = arith.mulf %16, %48 : vector<8x128xf32>
    %52 = arith.index_cast %50 : i32 to index
    %c0_22 = arith.constant 0 : index
    %53 = vector.load %arg4[%52, %c0_22] : memref<64x128xf32, #tpu.memory_space<vmem>>, vector<8x128xf32>
    %cst_23 = arith.constant dense<0.000000e+00> : vector<8x128xf32>
    %54 = tpu.matmul %47, %18, %cst_23 {dimension_numbers = #tpu.dot_dimension_numbers<[1], [0], [0], [1], [0, 0, 1, 1], [], []>} : vector<8x32xf32>, vector<32x128xf32>, vector<8x128xf32> -> vector<8x128xf32>
    %55 = arith.addf %53, %54 : vector<8x128xf32>
    %56 = arith.addf %51, %55 : vector<8x128xf32>
    %c64_i32 = arith.constant 64 : i32
    %57 = tpu.dynamic_rotate %56 by %c64_i32 dim 1 : vector<8x128xf32>, i32 -> vector<8x128xf32>
    %58 = arith.addf %56, %57 : vector<8x128xf32>
    %c32_i32 = arith.constant 32 : i32
    %59 = tpu.dynamic_rotate %58 by %c32_i32 dim 1 : vector<8x128xf32>, i32 -> vector<8x128xf32>
    %60 = arith.addf %58, %59 : vector<8x128xf32>
    %61 = arith.mulf %25, %47 : vector<8x32xf32>
    %62 = vector.extract_strided_slice %60 {offsets = [0, 0], sizes = [8, 32], strides = [1, 1]} : vector<8x128xf32> to vector<8x32xf32>
    %63 = arith.mulf %27, %62 : vector<8x32xf32>
    %64 = arith.addf %61, %63 : vector<8x32xf32>
    %65 = arith.index_cast %50 : i32 to index
    %c0_24 = arith.constant 0 : index
    %66 = vector.load %arg5[%65, %c0_24] : memref<64x32xf32, #tpu.memory_space<vmem>>, vector<8x32xf32>
    tpu.vector_store %arg5[%65, %c0_24], %64 {strides = array<i32>} : memref<64x32xf32, #tpu.memory_space<vmem>>, vector<8x32xf32>,
    %c1_i32 = arith.constant 1 : i32
    %c8_i32_25 = arith.constant 8 : i32
    %67 = arith.muli %c1_i32, %c8_i32_25 : i32
    %68 = tpu.assume_multiple %67, 8 : i32
    %69 = arith.mulf %16, %56 : vector<8x128xf32>
    %70 = arith.index_cast %68 : i32 to index
    %c0_26 = arith.constant 0 : index
    %71 = vector.load %arg4[%70, %c0_26] : memref<64x128xf32, #tpu.memory_space<vmem>>, vector<8x128xf32>
    %cst_27 = arith.constant dense<0.000000e+00> : vector<8x128xf32>
    %72 = tpu.matmul %64, %18, %cst_27 {dimension_numbers = #tpu.dot_dimension_numbers<[1], [0], [0], [1], [0, 0, 1, 1], [], []>} : vector<8x32xf32>, vector<32x128xf32>, vector<8x128xf32> -> vector<8x128xf32>
    %73 = arith.addf %71, %72 : vector<8x128xf32>
    %74 = arith.addf %69, %73 : vector<8x128xf32>
    %c64_i32_28 = arith.constant 64 : i32
    %75 = tpu.dynamic_rotate %74 by %c64_i32_28 dim 1 : vector<8x128xf32>, i32 -> vector<8x128xf32>
    %76 = arith.addf %74, %75 : vector<8x128xf32>
    %c32_i32_29 = arith.constant 32 : i32
    %77 = tpu.dynamic_rotate %76 by %c32_i32_29 dim 1 : vector<8x128xf32>, i32 -> vector<8x128xf32>
    %78 = arith.addf %76, %77 : vector<8x128xf32>
    %79 = arith.mulf %25, %64 : vector<8x32xf32>
    %80 = vector.extract_strided_slice %78 {offsets = [0, 0], sizes = [8, 32], strides = [1, 1]} : vector<8x128xf32> to vector<8x32xf32>
    %81 = arith.mulf %27, %80 : vector<8x32xf32>
    %82 = arith.addf %79, %81 : vector<8x32xf32>
    %83 = arith.index_cast %68 : i32 to index
    %c0_30 = arith.constant 0 : index
    %84 = vector.load %arg5[%83, %c0_30] : memref<64x32xf32, #tpu.memory_space<vmem>>, vector<8x32xf32>
    tpu.vector_store %arg5[%83, %c0_30], %82 {strides = array<i32>} : memref<64x32xf32, #tpu.memory_space<vmem>>, vector<8x32xf32>,
    %c2_i32 = arith.constant 2 : i32
    %c8_i32_31 = arith.constant 8 : i32
    %85 = arith.muli %c2_i32, %c8_i32_31 : i32
    %86 = tpu.assume_multiple %85, 8 : i32
    %87 = arith.mulf %16, %74 : vector<8x128xf32>
    %88 = arith.index_cast %86 : i32 to index
    %c0_32 = arith.constant 0 : index
    %89 = vector.load %arg4[%88, %c0_32] : memref<64x128xf32, #tpu.memory_space<vmem>>, vector<8x128xf32>
    %cst_33 = arith.constant dense<0.000000e+00> : vector<8x128xf32>
    %90 = tpu.matmul %82, %18, %cst_33 {dimension_numbers = #tpu.dot_dimension_numbers<[1], [0], [0], [1], [0, 0, 1, 1], [], []>} : vector<8x32xf32>, vector<32x128xf32>, vector<8x128xf32> -> vector<8x128xf32>
    %91 = arith.addf %89, %90 : vector<8x128xf32>
    %92 = arith.addf %87, %91 : vector<8x128xf32>
    %c64_i32_34 = arith.constant 64 : i32
    %93 = tpu.dynamic_rotate %92 by %c64_i32_34 dim 1 : vector<8x128xf32>, i32 -> vector<8x128xf32>
    %94 = arith.addf %92, %93 : vector<8x128xf32>
    %c32_i32_35 = arith.constant 32 : i32
    %95 = tpu.dynamic_rotate %94 by %c32_i32_35 dim 1 : vector<8x128xf32>, i32 -> vector<8x128xf32>
    %96 = arith.addf %94, %95 : vector<8x128xf32>
    %97 = arith.mulf %25, %82 : vector<8x32xf32>
    %98 = vector.extract_strided_slice %96 {offsets = [0, 0], sizes = [8, 32], strides = [1, 1]} : vector<8x128xf32> to vector<8x32xf32>
    %99 = arith.mulf %27, %98 : vector<8x32xf32>
    %100 = arith.addf %97, %99 : vector<8x32xf32>
    %101 = arith.index_cast %86 : i32 to index
    %c0_36 = arith.constant 0 : index
    %102 = vector.load %arg5[%101, %c0_36] : memref<64x32xf32, #tpu.memory_space<vmem>>, vector<8x32xf32>
    tpu.vector_store %arg5[%101, %c0_36], %100 {strides = array<i32>} : memref<64x32xf32, #tpu.memory_space<vmem>>, vector<8x32xf32>,
    %c3_i32 = arith.constant 3 : i32
    %c8_i32_37 = arith.constant 8 : i32
    %103 = arith.muli %c3_i32, %c8_i32_37 : i32
    %104 = tpu.assume_multiple %103, 8 : i32
    %105 = arith.mulf %16, %92 : vector<8x128xf32>
    %106 = arith.index_cast %104 : i32 to index
    %c0_38 = arith.constant 0 : index
    %107 = vector.load %arg4[%106, %c0_38] : memref<64x128xf32, #tpu.memory_space<vmem>>, vector<8x128xf32>
    %cst_39 = arith.constant dense<0.000000e+00> : vector<8x128xf32>
    %108 = tpu.matmul %100, %18, %cst_39 {dimension_numbers = #tpu.dot_dimension_numbers<[1], [0], [0], [1], [0, 0, 1, 1], [], []>} : vector<8x32xf32>, vector<32x128xf32>, vector<8x128xf32> -> vector<8x128xf32>
    %109 = arith.addf %107, %108 : vector<8x128xf32>
    %110 = arith.addf %105, %109 : vector<8x128xf32>
    %c64_i32_40 = arith.constant 64 : i32
    %111 = tpu.dynamic_rotate %110 by %c64_i32_40 dim 1 : vector<8x128xf32>, i32 -> vector<8x128xf32>
    %112 = arith.addf %110, %111 : vector<8x128xf32>
    %c32_i32_41 = arith.constant 32 : i32
    %113 = tpu.dynamic_rotate %112 by %c32_i32_41 dim 1 : vector<8x128xf32>, i32 -> vector<8x128xf32>
    %114 = arith.addf %112, %113 : vector<8x128xf32>
    %115 = arith.mulf %25, %100 : vector<8x32xf32>
    %116 = vector.extract_strided_slice %114 {offsets = [0, 0], sizes = [8, 32], strides = [1, 1]} : vector<8x128xf32> to vector<8x32xf32>
    %117 = arith.mulf %27, %116 : vector<8x32xf32>
    %118 = arith.addf %115, %117 : vector<8x32xf32>
    %119 = arith.index_cast %104 : i32 to index
    %c0_42 = arith.constant 0 : index
    %120 = vector.load %arg5[%119, %c0_42] : memref<64x32xf32, #tpu.memory_space<vmem>>, vector<8x32xf32>
    tpu.vector_store %arg5[%119, %c0_42], %118 {strides = array<i32>} : memref<64x32xf32, #tpu.memory_space<vmem>>, vector<8x32xf32>,
    %c4_i32 = arith.constant 4 : i32
    %c8_i32_43 = arith.constant 8 : i32
    %121 = arith.muli %c4_i32, %c8_i32_43 : i32
    %122 = tpu.assume_multiple %121, 8 : i32
    %123 = arith.mulf %16, %110 : vector<8x128xf32>
    %124 = arith.index_cast %122 : i32 to index
    %c0_44 = arith.constant 0 : index
    %125 = vector.load %arg4[%124, %c0_44] : memref<64x128xf32, #tpu.memory_space<vmem>>, vector<8x128xf32>
    %cst_45 = arith.constant dense<0.000000e+00> : vector<8x128xf32>
    %126 = tpu.matmul %118, %18, %cst_45 {dimension_numbers = #tpu.dot_dimension_numbers<[1], [0], [0], [1], [0, 0, 1, 1], [], []>} : vector<8x32xf32>, vector<32x128xf32>, vector<8x128xf32> -> vector<8x128xf32>
    %127 = arith.addf %125, %126 : vector<8x128xf32>
    %128 = arith.addf %123, %127 : vector<8x128xf32>
    %c64_i32_46 = arith.constant 64 : i32
    %129 = tpu.dynamic_rotate %128 by %c64_i32_46 dim 1 : vector<8x128xf32>, i32 -> vector<8x128xf32>
    %130 = arith.addf %128, %129 : vector<8x128xf32>
    %c32_i32_47 = arith.constant 32 : i32
    %131 = tpu.dynamic_rotate %130 by %c32_i32_47 dim 1 : vector<8x128xf32>, i32 -> vector<8x128xf32>
    %132 = arith.addf %130, %131 : vector<8x128xf32>
    %133 = arith.mulf %25, %118 : vector<8x32xf32>
    %134 = vector.extract_strided_slice %132 {offsets = [0, 0], sizes = [8, 32], strides = [1, 1]} : vector<8x128xf32> to vector<8x32xf32>
    %135 = arith.mulf %27, %134 : vector<8x32xf32>
    %136 = arith.addf %133, %135 : vector<8x32xf32>
    %137 = arith.index_cast %122 : i32 to index
    %c0_48 = arith.constant 0 : index
    %138 = vector.load %arg5[%137, %c0_48] : memref<64x32xf32, #tpu.memory_space<vmem>>, vector<8x32xf32>
    tpu.vector_store %arg5[%137, %c0_48], %136 {strides = array<i32>} : memref<64x32xf32, #tpu.memory_space<vmem>>, vector<8x32xf32>,
    %c5_i32 = arith.constant 5 : i32
    %c8_i32_49 = arith.constant 8 : i32
    %139 = arith.muli %c5_i32, %c8_i32_49 : i32
    %140 = tpu.assume_multiple %139, 8 : i32
    %141 = arith.mulf %16, %128 : vector<8x128xf32>
    %142 = arith.index_cast %140 : i32 to index
    %c0_50 = arith.constant 0 : index
    %143 = vector.load %arg4[%142, %c0_50] : memref<64x128xf32, #tpu.memory_space<vmem>>, vector<8x128xf32>
    %cst_51 = arith.constant dense<0.000000e+00> : vector<8x128xf32>
    %144 = tpu.matmul %136, %18, %cst_51 {dimension_numbers = #tpu.dot_dimension_numbers<[1], [0], [0], [1], [0, 0, 1, 1], [], []>} : vector<8x32xf32>, vector<32x128xf32>, vector<8x128xf32> -> vector<8x128xf32>
    %145 = arith.addf %143, %144 : vector<8x128xf32>
    %146 = arith.addf %141, %145 : vector<8x128xf32>
    %c64_i32_52 = arith.constant 64 : i32
    %147 = tpu.dynamic_rotate %146 by %c64_i32_52 dim 1 : vector<8x128xf32>, i32 -> vector<8x128xf32>
    %148 = arith.addf %146, %147 : vector<8x128xf32>
    %c32_i32_53 = arith.constant 32 : i32
    %149 = tpu.dynamic_rotate %148 by %c32_i32_53 dim 1 : vector<8x128xf32>, i32 -> vector<8x128xf32>
    %150 = arith.addf %148, %149 : vector<8x128xf32>
    %151 = arith.mulf %25, %136 : vector<8x32xf32>
    %152 = vector.extract_strided_slice %150 {offsets = [0, 0], sizes = [8, 32], strides = [1, 1]} : vector<8x128xf32> to vector<8x32xf32>
    %153 = arith.mulf %27, %152 : vector<8x32xf32>
    %154 = arith.addf %151, %153 : vector<8x32xf32>
    %155 = arith.index_cast %140 : i32 to index
    %c0_54 = arith.constant 0 : index
    %156 = vector.load %arg5[%155, %c0_54] : memref<64x32xf32, #tpu.memory_space<vmem>>, vector<8x32xf32>
    tpu.vector_store %arg5[%155, %c0_54], %154 {strides = array<i32>} : memref<64x32xf32, #tpu.memory_space<vmem>>, vector<8x32xf32>,
    %c6_i32 = arith.constant 6 : i32
    %c8_i32_55 = arith.constant 8 : i32
    %157 = arith.muli %c6_i32, %c8_i32_55 : i32
    %158 = tpu.assume_multiple %157, 8 : i32
    %159 = arith.mulf %16, %146 : vector<8x128xf32>
    %160 = arith.index_cast %158 : i32 to index
    %c0_56 = arith.constant 0 : index
    %161 = vector.load %arg4[%160, %c0_56] : memref<64x128xf32, #tpu.memory_space<vmem>>, vector<8x128xf32>
    %cst_57 = arith.constant dense<0.000000e+00> : vector<8x128xf32>
    %162 = tpu.matmul %154, %18, %cst_57 {dimension_numbers = #tpu.dot_dimension_numbers<[1], [0], [0], [1], [0, 0, 1, 1], [], []>} : vector<8x32xf32>, vector<32x128xf32>, vector<8x128xf32> -> vector<8x128xf32>
    %163 = arith.addf %161, %162 : vector<8x128xf32>
    %164 = arith.addf %159, %163 : vector<8x128xf32>
    %c64_i32_58 = arith.constant 64 : i32
    %165 = tpu.dynamic_rotate %164 by %c64_i32_58 dim 1 : vector<8x128xf32>, i32 -> vector<8x128xf32>
    %166 = arith.addf %164, %165 : vector<8x128xf32>
    %c32_i32_59 = arith.constant 32 : i32
    %167 = tpu.dynamic_rotate %166 by %c32_i32_59 dim 1 : vector<8x128xf32>, i32 -> vector<8x128xf32>
    %168 = arith.addf %166, %167 : vector<8x128xf32>
    %169 = arith.mulf %25, %154 : vector<8x32xf32>
    %170 = vector.extract_strided_slice %168 {offsets = [0, 0], sizes = [8, 32], strides = [1, 1]} : vector<8x128xf32> to vector<8x32xf32>
    %171 = arith.mulf %27, %170 : vector<8x32xf32>
    %172 = arith.addf %169, %171 : vector<8x32xf32>
    %173 = arith.index_cast %158 : i32 to index
    %c0_60 = arith.constant 0 : index
    %174 = vector.load %arg5[%173, %c0_60] : memref<64x32xf32, #tpu.memory_space<vmem>>, vector<8x32xf32>
    tpu.vector_store %arg5[%173, %c0_60], %172 {strides = array<i32>} : memref<64x32xf32, #tpu.memory_space<vmem>>, vector<8x32xf32>,
    %c7_i32 = arith.constant 7 : i32
    %c8_i32_61 = arith.constant 8 : i32
    %175 = arith.muli %c7_i32, %c8_i32_61 : i32
    %176 = tpu.assume_multiple %175, 8 : i32
    %177 = arith.mulf %16, %164 : vector<8x128xf32>
    %178 = arith.index_cast %176 : i32 to index
    %c0_62 = arith.constant 0 : index
    %179 = vector.load %arg4[%178, %c0_62] : memref<64x128xf32, #tpu.memory_space<vmem>>, vector<8x128xf32>
    %cst_63 = arith.constant dense<0.000000e+00> : vector<8x128xf32>
    %180 = tpu.matmul %172, %18, %cst_63 {dimension_numbers = #tpu.dot_dimension_numbers<[1], [0], [0], [1], [0, 0, 1, 1], [], []>} : vector<8x32xf32>, vector<32x128xf32>, vector<8x128xf32> -> vector<8x128xf32>
    %181 = arith.addf %179, %180 : vector<8x128xf32>
    %182 = arith.addf %177, %181 : vector<8x128xf32>
    %c64_i32_64 = arith.constant 64 : i32
    %183 = tpu.dynamic_rotate %182 by %c64_i32_64 dim 1 : vector<8x128xf32>, i32 -> vector<8x128xf32>
    %184 = arith.addf %182, %183 : vector<8x128xf32>
    %c32_i32_65 = arith.constant 32 : i32
    %185 = tpu.dynamic_rotate %184 by %c32_i32_65 dim 1 : vector<8x128xf32>, i32 -> vector<8x128xf32>
    %186 = arith.addf %184, %185 : vector<8x128xf32>
    %187 = arith.mulf %25, %172 : vector<8x32xf32>
    %188 = vector.extract_strided_slice %186 {offsets = [0, 0], sizes = [8, 32], strides = [1, 1]} : vector<8x128xf32> to vector<8x32xf32>
    %189 = arith.mulf %27, %188 : vector<8x32xf32>
    %190 = arith.addf %187, %189 : vector<8x32xf32>
    %191 = arith.index_cast %176 : i32 to index
    %c0_66 = arith.constant 0 : index
    %192 = vector.load %arg5[%191, %c0_66] : memref<64x32xf32, #tpu.memory_space<vmem>>, vector<8x32xf32>
    tpu.vector_store %arg5[%191, %c0_66], %190 {strides = array<i32>} : memref<64x32xf32, #tpu.memory_space<vmem>>, vector<8x32xf32>,
    %c8_i32_67 = arith.constant 8 : i32
    %c0_68 = arith.constant 0 : index
    %c0_69 = arith.constant 0 : index
    %193 = vector.load %arg5[%c0_68, %c0_69] : memref<64x32xf32, #tpu.memory_space<vmem>>, vector<64x32xf32>
    %cst_70 = arith.constant dense<0.000000e+00> : vector<64x32xf32>
    %194 = tpu.matmul %193, %38, %cst_70 {dimension_numbers = #tpu.dot_dimension_numbers<[1], [0], [0], [1], [0, 0, 1, 1], [], []>} : vector<64x32xf32>, vector<32x32xf32>, vector<64x32xf32> -> vector<64x32xf32>
    %195 = vector.broadcast %39 : vector<1x32xf32> to vector<64x32xf32>
    %196 = arith.addf %194, %195 : vector<64x32xf32>
    %c0_71 = arith.constant 0 : index
    %c0_72 = arith.constant 0 : index
    %197 = vector.load %arg5[%c0_71, %c0_72] : memref<64x32xf32, #tpu.memory_space<vmem>>, vector<64x32xf32>
    tpu.vector_store %arg5[%c0_71, %c0_72], %196 {strides = array<i32>} : memref<64x32xf32, #tpu.memory_space<vmem>>, vector<64x32xf32>,
    %c0_i32_73 = arith.constant 0 : i32
    %c8_i32_74 = arith.constant 8 : i32
    %198 = arith.muli %c0_i32_73, %c8_i32_74 : i32
    %199 = tpu.assume_multiple %198, 8 : i32
    %200 = arith.mulf %34, %47 : vector<8x32xf32>
    %201 = arith.index_cast %199 : i32 to index
    %c0_75 = arith.constant 0 : index
    %202 = vector.load %arg5[%201, %c0_75] : memref<64x32xf32, #tpu.memory_space<vmem>>, vector<8x32xf32>
    %203 = arith.addf %200, %202 : vector<8x32xf32>
    %204 = arith.index_cast %c0_i32_73 : i32 to index
    %c0_76 = arith.constant 0 : index
    %c0_77 = arith.constant 0 : index
    %205 = vector.load %arg3[%204, %c0_76, %c0_77] : memref<8x8x32xf32, #tpu.memory_space<vmem>>, vector<1x8x32xf32>
    %206 = vector.shape_cast %205 : vector<1x8x32xf32> to vector<8x32xf32>
    %207 = vector.shape_cast %203 : vector<8x32xf32> to vector<1x8x32xf32>
    tpu.vector_store %arg3[%204, %c0_76, %c0_77], %207 {strides = array<i32>} : memref<8x8x32xf32, #tpu.memory_space<vmem>>, vector<1x8x32xf32>,
    %c1_i32_78 = arith.constant 1 : i32
    %c8_i32_79 = arith.constant 8 : i32
    %208 = arith.muli %c1_i32_78, %c8_i32_79 : i32
    %209 = tpu.assume_multiple %208, 8 : i32
    %210 = arith.mulf %34, %203 : vector<8x32xf32>
    %211 = arith.index_cast %209 : i32 to index
    %c0_80 = arith.constant 0 : index
    %212 = vector.load %arg5[%211, %c0_80] : memref<64x32xf32, #tpu.memory_space<vmem>>, vector<8x32xf32>
    %213 = arith.addf %210, %212 : vector<8x32xf32>
    %214 = arith.index_cast %c1_i32_78 : i32 to index
    %c0_81 = arith.constant 0 : index
    %c0_82 = arith.constant 0 : index
    %215 = vector.load %arg3[%214, %c0_81, %c0_82] : memref<8x8x32xf32, #tpu.memory_space<vmem>>, vector<1x8x32xf32>
    %216 = vector.shape_cast %215 : vector<1x8x32xf32> to vector<8x32xf32>
    %217 = vector.shape_cast %213 : vector<8x32xf32> to vector<1x8x32xf32>
    tpu.vector_store %arg3[%214, %c0_81, %c0_82], %217 {strides = array<i32>} : memref<8x8x32xf32, #tpu.memory_space<vmem>>, vector<1x8x32xf32>,
    %c2_i32_83 = arith.constant 2 : i32
    %c8_i32_84 = arith.constant 8 : i32
    %218 = arith.muli %c2_i32_83, %c8_i32_84 : i32
    %219 = tpu.assume_multiple %218, 8 : i32
    %220 = arith.mulf %34, %213 : vector<8x32xf32>
    %221 = arith.index_cast %219 : i32 to index
    %c0_85 = arith.constant 0 : index
    %222 = vector.load %arg5[%221, %c0_85] : memref<64x32xf32, #tpu.memory_space<vmem>>, vector<8x32xf32>
    %223 = arith.addf %220, %222 : vector<8x32xf32>
    %224 = arith.index_cast %c2_i32_83 : i32 to index
    %c0_86 = arith.constant 0 : index
    %c0_87 = arith.constant 0 : index
    %225 = vector.load %arg3[%224, %c0_86, %c0_87] : memref<8x8x32xf32, #tpu.memory_space<vmem>>, vector<1x8x32xf32>
    %226 = vector.shape_cast %225 : vector<1x8x32xf32> to vector<8x32xf32>
    %227 = vector.shape_cast %223 : vector<8x32xf32> to vector<1x8x32xf32>
    tpu.vector_store %arg3[%224, %c0_86, %c0_87], %227 {strides = array<i32>} : memref<8x8x32xf32, #tpu.memory_space<vmem>>, vector<1x8x32xf32>,
    %c3_i32_88 = arith.constant 3 : i32
    %c8_i32_89 = arith.constant 8 : i32
    %228 = arith.muli %c3_i32_88, %c8_i32_89 : i32
    %229 = tpu.assume_multiple %228, 8 : i32
    %230 = arith.mulf %34, %223 : vector<8x32xf32>
    %231 = arith.index_cast %229 : i32 to index
    %c0_90 = arith.constant 0 : index
    %232 = vector.load %arg5[%231, %c0_90] : memref<64x32xf32, #tpu.memory_space<vmem>>, vector<8x32xf32>
    %233 = arith.addf %230, %232 : vector<8x32xf32>
    %234 = arith.index_cast %c3_i32_88 : i32 to index
    %c0_91 = arith.constant 0 : index
    %c0_92 = arith.constant 0 : index
    %235 = vector.load %arg3[%234, %c0_91, %c0_92] : memref<8x8x32xf32, #tpu.memory_space<vmem>>, vector<1x8x32xf32>
    %236 = vector.shape_cast %235 : vector<1x8x32xf32> to vector<8x32xf32>
    %237 = vector.shape_cast %233 : vector<8x32xf32> to vector<1x8x32xf32>
    tpu.vector_store %arg3[%234, %c0_91, %c0_92], %237 {strides = array<i32>} : memref<8x8x32xf32, #tpu.memory_space<vmem>>, vector<1x8x32xf32>,
    %c4_i32_93 = arith.constant 4 : i32
    %c8_i32_94 = arith.constant 8 : i32
    %238 = arith.muli %c4_i32_93, %c8_i32_94 : i32
    %239 = tpu.assume_multiple %238, 8 : i32
    %240 = arith.mulf %34, %233 : vector<8x32xf32>
    %241 = arith.index_cast %239 : i32 to index
    %c0_95 = arith.constant 0 : index
    %242 = vector.load %arg5[%241, %c0_95] : memref<64x32xf32, #tpu.memory_space<vmem>>, vector<8x32xf32>
    %243 = arith.addf %240, %242 : vector<8x32xf32>
    %244 = arith.index_cast %c4_i32_93 : i32 to index
    %c0_96 = arith.constant 0 : index
    %c0_97 = arith.constant 0 : index
    %245 = vector.load %arg3[%244, %c0_96, %c0_97] : memref<8x8x32xf32, #tpu.memory_space<vmem>>, vector<1x8x32xf32>
    %246 = vector.shape_cast %245 : vector<1x8x32xf32> to vector<8x32xf32>
    %247 = vector.shape_cast %243 : vector<8x32xf32> to vector<1x8x32xf32>
    tpu.vector_store %arg3[%244, %c0_96, %c0_97], %247 {strides = array<i32>} : memref<8x8x32xf32, #tpu.memory_space<vmem>>, vector<1x8x32xf32>,
    %c5_i32_98 = arith.constant 5 : i32
    %c8_i32_99 = arith.constant 8 : i32
    %248 = arith.muli %c5_i32_98, %c8_i32_99 : i32
    %249 = tpu.assume_multiple %248, 8 : i32
    %250 = arith.mulf %34, %243 : vector<8x32xf32>
    %251 = arith.index_cast %249 : i32 to index
    %c0_100 = arith.constant 0 : index
    %252 = vector.load %arg5[%251, %c0_100] : memref<64x32xf32, #tpu.memory_space<vmem>>, vector<8x32xf32>
    %253 = arith.addf %250, %252 : vector<8x32xf32>
    %254 = arith.index_cast %c5_i32_98 : i32 to index
    %c0_101 = arith.constant 0 : index
    %c0_102 = arith.constant 0 : index
    %255 = vector.load %arg3[%254, %c0_101, %c0_102] : memref<8x8x32xf32, #tpu.memory_space<vmem>>, vector<1x8x32xf32>
    %256 = vector.shape_cast %255 : vector<1x8x32xf32> to vector<8x32xf32>
    %257 = vector.shape_cast %253 : vector<8x32xf32> to vector<1x8x32xf32>
    tpu.vector_store %arg3[%254, %c0_101, %c0_102], %257 {strides = array<i32>} : memref<8x8x32xf32, #tpu.memory_space<vmem>>, vector<1x8x32xf32>,
    %c6_i32_103 = arith.constant 6 : i32
    %c8_i32_104 = arith.constant 8 : i32
    %258 = arith.muli %c6_i32_103, %c8_i32_104 : i32
    %259 = tpu.assume_multiple %258, 8 : i32
    %260 = arith.mulf %34, %253 : vector<8x32xf32>
    %261 = arith.index_cast %259 : i32 to index
    %c0_105 = arith.constant 0 : index
    %262 = vector.load %arg5[%261, %c0_105] : memref<64x32xf32, #tpu.memory_space<vmem>>, vector<8x32xf32>
    %263 = arith.addf %260, %262 : vector<8x32xf32>
    %264 = arith.index_cast %c6_i32_103 : i32 to index
    %c0_106 = arith.constant 0 : index
    %c0_107 = arith.constant 0 : index
    %265 = vector.load %arg3[%264, %c0_106, %c0_107] : memref<8x8x32xf32, #tpu.memory_space<vmem>>, vector<1x8x32xf32>
    %266 = vector.shape_cast %265 : vector<1x8x32xf32> to vector<8x32xf32>
    %267 = vector.shape_cast %263 : vector<8x32xf32> to vector<1x8x32xf32>
    tpu.vector_store %arg3[%264, %c0_106, %c0_107], %267 {strides = array<i32>} : memref<8x8x32xf32, #tpu.memory_space<vmem>>, vector<1x8x32xf32>,
    %c7_i32_108 = arith.constant 7 : i32
    %c8_i32_109 = arith.constant 8 : i32
    %268 = arith.muli %c7_i32_108, %c8_i32_109 : i32
    %269 = tpu.assume_multiple %268, 8 : i32
    %270 = arith.mulf %34, %263 : vector<8x32xf32>
    %271 = arith.index_cast %269 : i32 to index
    %c0_110 = arith.constant 0 : index
    %272 = vector.load %arg5[%271, %c0_110] : memref<64x32xf32, #tpu.memory_space<vmem>>, vector<8x32xf32>
    %273 = arith.addf %270, %272 : vector<8x32xf32>
    %274 = arith.index_cast %c7_i32_108 : i32 to index
    %c0_111 = arith.constant 0 : index
    %c0_112 = arith.constant 0 : index
    %275 = vector.load %arg3[%274, %c0_111, %c0_112] : memref<8x8x32xf32, #tpu.memory_space<vmem>>, vector<1x8x32xf32>
    %276 = vector.shape_cast %275 : vector<1x8x32xf32> to vector<8x32xf32>
    %277 = vector.shape_cast %273 : vector<8x32xf32> to vector<1x8x32xf32>
    tpu.vector_store %arg3[%274, %c0_111, %c0_112], %277 {strides = array<i32>} : memref<8x8x32xf32, #tpu.memory_space<vmem>>, vector<1x8x32xf32>,
    %c8_i32_113 = arith.constant 8 : i32
    return
  }
}

</mosaic_0001>

<bundles_post_ra>
// kernel: tpu_custom_call.1
= control target key start
LH: loop header
LB: loop body
LE: loop exit
PB: predicated region body
PF: predicated region fallthrough
CT: control target
= control target key end

     0   :  { %vm92_vm0 = vcmask 130048   ;;  %s1797_s0 = inlined_call_operand.vmem [shape: f32[64,16], index: 0, kind: input, shape index: {}]   ;;  %s1798_s1 = inlined_call_operand.vmem [shape: f32[64,128], index: 1, kind: input, shape index: {}]   ;;  %s1799_s2 = inlined_call_operand.vmem [shape: f32[56,32], index: 2, kind: input, shape index: {}]   ;;  %s1800_s3 = inlined_call_operand.hbm [shape: f32[8,8,32], index: 3, kind: output, shape index: {}]  }
   0x1   :  { %v15_v0 = vld [vmem:[%s1798_s1] sm:$0xff]  ;;  %v16_v1 = vld [vmem:[%s1798_s1 + $0x8] sm:$0xff]  ;;  %v22_v4 = vld [vmem:[%s1798_s1 + $0x38] sm:$0x1] }
   0x2   :  { %v84_v2 = vld [vmem:[%s1797_s0 + $0x20] sm:$0xff]  ;;  %v1366_v3 = vpack.c.bf16 %v16_v1, %v15_v0  ;;  %v1153_v6 = vmul.f32 -1.442695, %v22_v4  ;;  %v85_v7 = vld [vmem:[%s1797_s0 + $0x28] sm:$0xff] }
   0x3   :  { %1252 = vmatprep.mubr.msk.f32.mxu1 %vm92_vm0, %v84_v2  ;;  %v80_v5 = vld [vmem:[%s1797_s0] sm:$0xff]  ;;  %v81_v8 = vld [vmem:[%s1797_s0 + $0x8] sm:$0xff] }
   0x4   :  { %1426 = vmatprep.subr.bf16.mxu1 %v1366_v3  ;;  %1367 = vmatprep.subr.bf16.mxu0 %v1366_v3 }
   0x5   :  { %1427 = vmatpush3.bf16.msra.mxu1 %v1366_v3  ;;  %1369 = vmatpush3.bf16.msra.mxu0 %v1366_v3 }
   0x6   :  { %8 = vsyncpa [#allocation5], 0  ;;  %v1472_v9 = vmov 0.0|0.0   ;;  %1436 = vpow2.f32 %v1153_v6  ;;  %1246 = vmatprep.mubr.msk.f32.mxu0 %vm92_vm0, %v80_v5  ;;  %v86_v10 = vld [vmem:[%s1797_s0 + $0x30] sm:$0xff]  ;;  %v87_v11 = vld [vmem:[%s1797_s0 + $0x38] sm:$0xff]  ;;  %vm1473_vm1 = vmmov 0   ;;  %v37_v15 = vlaneseq }
   0x7   :  { %1370 = vmatprep.subr.bf16.mxu1 %v1472_v9  ;;  %1382 = vmatprep.subr.bf16.mxu0 %v1472_v9  ;;  %v1474_v12 = vmov 0.0   ;;  %v17_v19 = vld [vmem:[%s1798_s1 + $0x10] sm:$0xff]  ;;  %v18_v21 = vld [vmem:[%s1798_s1 + $0x18] sm:$0xff]  ;;  %v19_v22 = vld [vmem:[%s1798_s1 + $0x20] sm:$0xff]  ;;  %s1475_s13 = smov 64   ;;  %vm240_vm2 = vcmask 261120  }
   0x8   :  { %1253 = vmatmul.mubr.msk.f32.vlgmr.msra.gmra.mrb[0].mxu1 %vm92_vm0, %v85_v7  ;;  %1247 = vmatmul.mubr.msk.f32.vlgmr.msra.gmra.mrb[0].mxu0 %vm92_vm0, %v81_v8  ;;  %v38_v16 = vshrl.u32 %v37_v15, 7  ;;  %v20_v23 = vld [vmem:[%s1798_s1 + $0x28] sm:$0xff]  ;;  %v1588_v37 = vld [vmem:[%s1798_s1 + $0x30] ss:$0 sm:$0xff]  ;;  %s1476_s1 = smov 32   ;;  %v83_v4 = vld [vmem:[%s1797_s0 + $0x18] sm:$0xff] }
   0x9   :  { %1255 = vmatprep.mubr.msk.f32.mxu1 %vm92_vm0, %v86_v10  ;;  %v23_v48 = vld [vmem:[%s1799_s2] sm:$0x1]  ;;  %v82_v3 = vld [vmem:[%s1797_s0 + $0x10] sm:$0xff] }
   0xa   :  { %v1537_v17 = vsub.s32 0, %v38_v16  ;;  %v1154_v49 = vmul.f32 -1.442695, %v23_v48  ;;  %1249 = vmatprep.mubr.msk.f32.mxu0 %vm92_vm0, %v82_v3 }
   0xc   :  { %1256 = vmatmul.mubr.msk.f32.gmra.mrb[2].mxu1 %vm92_vm0, %v87_v11  ;;  %1250 = vmatmul.mubr.msk.f32.gmra.mrb[2].mxu0 %vm92_vm0, %v83_v4 }
   0xd   :  { %1266 = vmatprep.mubr.msk.f32.mxu1 %vm1473_vm1, %v1474_v12  ;;  %1288 = vmatprep.mubr.msk.f32.mxu0 %vm1473_vm1, %v1474_v12 }
  0x10   :  { %v1437_v13 = vpop.eup %1436 }
  0x11   :  { %v33_v14 = vadd.f32 1.0, %v1437_v13 }
  0x13   :  { %1438 = vrcp.f32 %v33_v14 }
  0x14   :  { %1440 = vpow2.f32 %v1154_v49 }
  0x1d   :  { %v1439_v18 = vpop.eup %1438 }
  0x1e   :  { %v36_v20 = vsub.f32 1.0, %v1439_v18  ;;  %v1592_v39 = vrot.slane %v1439_v18, %v1537_v17  ;;  %v1441_v50 = vpop.eup %1440 }
  0x1f   :  { %v52_v51 = vadd.f32 1.0, %v1441_v50 }
  0x20   :  { %v1552_v24 = vrot.slane %v36_v20, %v1537_v17  ;;  %v238_v41 = vmul.f32 0.0, %v1592_v39 }
  0x21   :  { %1442 = vrcp.f32 %v52_v51 }
  0x22   :  { %v45_v25 = vmul.f32 %v1552_v24, %v17_v19  ;;  %v46_v26 = vmul.f32 %v1552_v24, %v18_v21  ;;  %v47_v27 = vmul.f32 %v1552_v24, %v19_v22  ;;  %v48_v28 = vmul.f32 %v1552_v24, %v20_v23 }
  0x24   :  { %v1558_v29 = vpack.c.bf16 %v46_v26, %v45_v25  ;;  %v1561_v30 = vpack.c.bf16 %v48_v28, %v47_v27 }
  0x26   :  { %1372 = vmatpush3.bf16.msra.mxu1 %v1558_v29  ;;  %1384 = vmatpush3.bf16.msra.mxu0 %v1558_v29 }
  0x27   :  { %1373 = vmatprep.subr.bf16.mxu1 %v1472_v9  ;;  %1385 = vmatprep.subr.bf16.mxu0 %v1472_v9 }
  0x2a   :  { %1375 = vmatpush3.bf16.msra.mxu1 %v1561_v30  ;;  %1387 = vmatpush3.bf16.msra.mxu0 %v1561_v30 }
  0x2b   :  { %1376 = vmatprep.subr.bf16.mxu1 %v1472_v9  ;;  %1394 = vmatprep.subr.bf16.mxu0 %v1472_v9  ;;  %v1443_v52 = vpop.eup %1442 }
  0x2c   :  { %v1602_v53 = vrot.slane %v1443_v52, %v1537_v17 }
  0x2d   :  { %1267 = vmatmul.mubr.f32.vlgmr.msra.gmra.mrb[4].mxu1 %v1474_v12 }
  0x2e   :  { %1378 = vmatpush3.bf16.msra.mxu1 %v1558_v29  ;;  %1277 = vmatprep.mubr.msk.f32.mxu1 %vm1473_vm1, %v1474_v12  ;;  %v1605_v54 = vsub.f32 1.0, %v1602_v53  ;;  %v322_v56 = vmul.f32 0.0, %v1602_v53 }
  0x2f   :  { %1379 = vmatprep.subr.bf16.mxu1 %v1472_v9 }
  0x32   :  { %1381 = vmatpush3.bf16.msra.mxu1 %v1561_v30 }
  0x33   :  { %1388 = vmatprep.subr.bf16.mxu1 %v1472_v9 }
  0xdb   :  { %v1577_v31 = vpop.f32.mrb[0].mxu1  ;;  %v1248_v32 = vpop.f32.mrb[0].mxu0 }
  0xdc   :  { %v1579_v33 = vpop.f32.mrb[1].mxu1  ;;  %v183_v34 = vpop.f32.mrb[1].mxu0  ;;  %v189_v60 = vadd.f32 %v1248_v32, %v1588_v37 }
  0xdd   :  { %v184_v38 = vadd.f32 %v1588_v37, %v183_v34 }
  0xde   :  { %v223_v61 = vmul.f32 %v189_v60, %v1552_v24 }
  0xdf   :  { %v1581_v35 = vpop.f32.mrb[2].mxu1  ;;  %v222_v40 = vmul.f32 %v184_v38, %v1552_v24  ;;  %v1251_v14 = vpop.f32.mrb[2].mxu0 }
  0xe0   :  { %v1583_v36 = vpop.f32.mrb[3].mxu1  ;;  %v193_v15 = vpop.f32.mrb[3].mxu0 }
  0xe1   :  { %v194_v16 = vadd.f32 %v1588_v37, %v193_v15 }
  0xe3   :  { %v224_v18 = vmul.f32 %v194_v16, %v1552_v24  ;;  %v24_v16 = vld [vmem:[%s1799_s2 + $0x8] sm:$0xff] }
 0x100   :  { %v310_v42 = vpop.f32.mrb[4].mxu1 }
 0x101   :  { %v314_v43 = vadd.f32 %v310_v42, %v222_v40  ;;  %v1268_v44 = vpop.f32.mrb[5].mxu1  ;;  %v199_v40 = vadd.f32 %v1251_v14, %v1588_v37 }
 0x103   :  { %v315_v45 = vadd.f32 %v314_v43, %v238_v41  ;;  %v225_v41 = vmul.f32 %v199_v40, %v1552_v24 }
 0x105   :  { %316 = vrot.lane.b32.xlu0 %v315_v45, %s1475_s13  ;;  %v326_v63 = vmul.f32 %v315_v45, %v1592_v39 }
 0x177   :  { %v317_v46 = vpop.permute.xlu0 %316 }
 0x178   :  { %v318_v47 = vadd.f32 %v317_v46, %v315_v45 }
 0x17a   :  { %319 = vrot.lane.b32.xlu0 %v318_v47, %s1476_s1 }
 0x1ec   :  { %v320_v55 = vpop.permute.xlu0 %319 }
 0x1ed   :  { %v321_v57 = vadd.f32 %v320_v55, %v318_v47 }
 0x1ef   :  { %v323_v58 = vmul.f32 %v321_v57, %v1605_v54 }
 0x1f1   :  { %v324_v59 = vadd.f32 %v323_v58, %v322_v56  ;;  %v204_v56 = vadd.f32 %v1588_v37, %v1579_v33 }
 0x1f3   :  { %325 = vst.msk [vmem:[#allocation3] sm:$0xff] %vm240_vm2, %v324_v59  ;;  %1278 = vmatmul.mubr.msk.f32.vlgmr.msra.gmra.mrb[6].mxu1 %vm240_vm2, %v324_v59  ;;  %v410_v10 = vmul.f32 %v324_v59, %v1602_v53  ;;  %v226_v57 = vmul.f32 %v204_v56, %v1552_v24 }
 0x1f4   :  { %1390 = vmatpush3.bf16.msra.mxu1 %v1558_v29  ;;  %1299 = vmatprep.mubr.msk.f32.mxu1 %vm1473_vm1, %v1474_v12 }
 0x1f5   :  { %1391 = vmatprep.subr.bf16.mxu1 %v1472_v9 }
 0x1f8   :  { %1393 = vmatpush3.bf16.msra.mxu1 %v1561_v30 }
 0x1f9   :  { %1400 = vmatprep.subr.bf16.mxu1 %v1472_v9 }
 0x2c6   :  { %v398_v62 = vpop.f32.mrb[6].mxu1 }
 0x2c7   :  { %v402_v0 = vadd.f32 %v398_v62, %v223_v61  ;;  %v1279_v1 = vpop.f32.mrb[7].mxu1 }
 0x2c9   :  { %v403_v2 = vadd.f32 %v402_v0, %v326_v63 }
 0x2cb   :  { %404 = vrot.lane.b32.xlu1 %v403_v2, %s1475_s13  ;;  %v415_v20 = vmul.f32 %v403_v2, %v1592_v39 }
 0x33d   :  { %v405_v5 = vpop.permute.xlu1 %404 }
 0x33e   :  { %v406_v6 = vadd.f32 %v405_v5, %v403_v2  ;;  %v209_v5 = vadd.f32 %v1577_v31, %v1588_v37 }
 0x340   :  { %407 = vrot.lane.b32.xlu1 %v406_v6, %s1476_s1 }
 0x3b2   :  { %v408_v7 = vpop.permute.xlu1 %407 }
 0x3b3   :  { %v409_v8 = vadd.f32 %v408_v7, %v406_v6  ;;  %v227_v6 = vmul.f32 %v209_v5, %v1552_v24 }
 0x3b5   :  { %v411_v11 = vmul.f32 %v409_v8, %v1605_v54 }
 0x3b7   :  { %v412_v13 = vadd.f32 %v411_v11, %v410_v10 }
 0x3b9   :  { %414 = vst.msk [vmem:[#allocation3 + $0x8] sm:$0xff] %vm240_vm2, %v412_v13  ;;  %1289 = vmatmul.mubr.msk.f32.vlgmr.msra.gmra.mrb[4].mxu0 %vm240_vm2, %v412_v13  ;;  %v499_v32 = vmul.f32 %v412_v13, %v1602_v53 }
 0x3ba   :  { %1396 = vmatpush3.bf16.msra.mxu0 %v1558_v29  ;;  %1310 = vmatprep.mubr.msk.f32.mxu0 %vm1473_vm1, %v1474_v12 }
 0x3bb   :  { %1397 = vmatprep.subr.bf16.mxu0 %v1472_v9 }
 0x3be   :  { %1399 = vmatpush3.bf16.msra.mxu0 %v1561_v30 }
 0x3bf   :  { %1406 = vmatprep.subr.bf16.mxu0 %v1472_v9 }
 0x48c   :  { %v487_v19 = vpop.f32.mrb[4].mxu0 }
 0x48d   :  { %v491_v21 = vadd.f32 %v487_v19, %v224_v18  ;;  %v1290_v22 = vpop.f32.mrb[5].mxu0  ;;  %v25_v18 = vld [vmem:[%s1799_s2 + $0x10] sm:$0xff] }
 0x48f   :  { %v492_v23 = vadd.f32 %v491_v21, %v415_v20 }
 0x491   :  { %493 = vrot.lane.b32.xlu0 %v492_v23, %s1475_s13  ;;  %v504_v43 = vmul.f32 %v492_v23, %v1592_v39 }
 0x503   :  { %v494_v25 = vpop.permute.xlu0 %493 }
 0x504   :  { %v495_v26 = vadd.f32 %v494_v25, %v492_v23  ;;  %v26_v25 = vld [vmem:[%s1799_s2 + $0x18] sm:$0xff] }
 0x506   :  { %496 = vrot.lane.b32.xlu1 %v495_v26, %s1476_s1 }
 0x578   :  { %v497_v27 = vpop.permute.xlu1 %496 }
 0x579   :  { %v498_v28 = vadd.f32 %v497_v27, %v495_v26  ;;  %v27_v26 = vld [vmem:[%s1799_s2 + $0x20] sm:$0xff] }
 0x57b   :  { %v500_v34 = vmul.f32 %v498_v28, %v1605_v54 }
 0x57d   :  { %v501_v38 = vadd.f32 %v500_v34, %v499_v32 }
 0x57f   :  { %503 = vst.msk [vmem:[#allocation3 + $0x10] sm:$0xff] %vm240_vm2, %v501_v38  ;;  %1300 = vmatmul.mubr.msk.f32.vlgmr.msra.gmra.mrb[8].mxu1 %vm240_vm2, %v501_v38  ;;  %v588_v51 = vmul.f32 %v501_v38, %v1602_v53 }
 0x580   :  { %1402 = vmatpush3.bf16.msra.mxu1 %v1558_v29  ;;  %1321 = vmatprep.mubr.msk.f32.mxu1 %vm1473_vm1, %v1474_v12 }
 0x581   :  { %1403 = vmatprep.subr.bf16.mxu1 %v1472_v9 }
 0x584   :  { %1405 = vmatpush3.bf16.msra.mxu1 %v1561_v30 }
 0x585   :  { %1412 = vmatprep.subr.bf16.mxu1 %v1472_v9 }
 0x652   :  { %v576_v42 = vpop.f32.mrb[8].mxu1 }
 0x653   :  { %v580_v44 = vadd.f32 %v576_v42, %v225_v41  ;;  %v1301_v45 = vpop.f32.mrb[9].mxu1 }
 0x654   :  { %v951_v45 = vld [vmem:[#allocation3 + $0x10] sm:$0xff] }
 0x655   :  { %v581_v46 = vadd.f32 %v580_v44, %v504_v43  ;;  %v949_v43 = vld [vmem:[#allocation3] sm:$0xff]  ;;  %v950_v44 = vld [vmem:[#allocation3 + $0x8] sm:$0xff] }
 0x657   :  { %582 = vrot.lane.b32.xlu0 %v581_v46, %s1475_s13  ;;  %v593_v59 = vmul.f32 %v581_v46, %v1592_v39 }
 0x6c9   :  { %v583_v47 = vpop.permute.xlu0 %582 }
 0x6ca   :  { %v584_v48 = vadd.f32 %v583_v47, %v581_v46 }
 0x6cc   :  { %585 = vrot.lane.b32.xlu1 %v584_v48, %s1476_s1 }
 0x73e   :  { %v586_v49 = vpop.permute.xlu1 %585 }
 0x73f   :  { %v587_v50 = vadd.f32 %v586_v49, %v584_v48  ;;  %v214_v49 = vadd.f32 %v1588_v37, %v1583_v36 }
 0x741   :  { %v589_v52 = vmul.f32 %v587_v50, %v1605_v54  ;;  %v28_v50 = vld [vmem:[%s1799_s2 + $0x28] sm:$0x1] }
 0x743   :  { %v590_v55 = vadd.f32 %v589_v52, %v588_v51  ;;  %v228_v51 = vmul.f32 %v214_v49, %v1552_v24 }
 0x745   :  { %592 = vst.msk [vmem:[#allocation3 + $0x18] sm:$0xff] %vm240_vm2, %v590_v55  ;;  %1311 = vmatmul.mubr.msk.f32.vlgmr.msra.gmra.mrb[6].mxu0 %vm240_vm2, %v590_v55  ;;  %v677_v3 = vmul.f32 %v590_v55, %v1602_v53 }
 0x746   :  { %1408 = vmatpush3.bf16.msra.mxu0 %v1558_v29  ;;  %1332 = vmatprep.mubr.msk.f32.mxu0 %vm1473_vm1, %v1474_v12 }
 0x747   :  { %1409 = vmatprep.subr.bf16.mxu0 %v1472_v9 }
 0x74a   :  { %1411 = vmatpush3.bf16.msra.mxu0 %v1561_v30 }
 0x74c   :  { %v952_v46 = vld [vmem:[#allocation3 + $0x18] sm:$0xff] }
 0x818   :  { %v665_v58 = vpop.f32.mrb[6].mxu0 }
 0x819   :  { %v669_v60 = vadd.f32 %v665_v58, %v226_v57  ;;  %v1312_v61 = vpop.f32.mrb[7].mxu0 }
 0x81b   :  { %v670_v62 = vadd.f32 %v669_v60, %v593_v59 }
 0x81d   :  { %671 = vrot.lane.b32.xlu0 %v670_v62, %s1475_s13  ;;  %v682_v8 = vmul.f32 %v670_v62, %v1592_v39 }
 0x88f   :  { %v672_v63 = vpop.permute.xlu0 %671 }
 0x890   :  { %v673_v0 = vadd.f32 %v672_v63, %v670_v62 }
 0x892   :  { %674 = vrot.lane.b32.xlu1 %v673_v0, %s1476_s1 }
 0x904   :  { %v675_v1 = vpop.permute.xlu1 %674 }
 0x905   :  { %v676_v2 = vadd.f32 %v675_v1, %v673_v0 }
 0x907   :  { %v678_v33 = vmul.f32 %v676_v2, %v1605_v54 }
 0x909   :  { %v679_v4 = vadd.f32 %v678_v33, %v677_v3 }
 0x90b   :  { %681 = vst.msk [vmem:[#allocation3 + $0x20] sm:$0xff] %vm240_vm2, %v679_v4  ;;  %1322 = vmatmul.mubr.msk.f32.vlgmr.msra.gmra.mrb[10].mxu1 %vm240_vm2, %v679_v4  ;;  %v766_v38 = vmul.f32 %v679_v4, %v1602_v53 }
 0x90c   :  { %1414 = vmatpush3.bf16.msra.mxu1 %v1558_v29  ;;  %1343 = vmatprep.mubr.msk.f32.mxu1 %vm1473_vm1, %v1474_v12  ;;  %v29_v12 = vld [vmem:[%s1799_s2 + $0x30] sm:$0x1]  ;;  %s1477_s2 = smov [#allocation4]  }
 0x90d   :  { %1415 = vmatprep.subr.bf16.mxu1 %v1472_v9  ;;  %v1155_v9 = vmul.f32 -1.442695, %v29_v12  ;;  %s1142_s4 = sshll.u32 %s1477_s2, 4  ;;  %s1143_s4 = int_to_ptr.vmem [resolvable:$true] %s1142_s4 }
 0x90e   :  { %s1448_s5 = scalar_lea.vmem %s1143_s4, 1024  ;;  %p1453_p1 = scmp.lt.s32.totalorder %s1143_s4, %s1143_s4 }
 0x90f   :  { %1444 = vpow2.f32 %v1155_v9  ;;  %p1449_p0 = scmp.ne.s32.totalorder %s1143_s4, %s1448_s5  ;;  %p1454_p2 = scmp.lt.s32.totalorder %s1448_s5, %s1448_s5 }
 0x910   :  { %1417 = vmatpush3.bf16.msra.mxu1 %v1561_v30 }
 0x911   :  { %p1455_p3 = por %p1454_p2, %p1453_p1 }
 0x912   :  { %v953_v47 = vld [vmem:[#allocation3 + $0x20] sm:$0xff] }
 0x913   :  { %p1456_p4 = pnand %p1455_p3, %p1449_p0 }
 0x919   :  { %v1445_v29 = vpop.eup %1444 }
 0x91a   :  { %v63_v30 = vadd.f32 1.0, %v1445_v29 }
 0x91c   :  { %1446 = vrcp.f32 %v63_v30 }
 0x926   :  { %v1447_v31 = vpop.eup %1446 }
 0x927   :  { %v70_v14 = vsub.f32 1.0, %v1447_v31  ;;  %v1737_v0 = vrot.slane %v1447_v31, %v1537_v17 }
 0x929   :  { %v74_v15 = vrot.slane %v70_v14, %v1537_v17  ;;  %v79_v55 = vmul.f32 %v70_v14, %v28_v50  ;;  %v1098_v5 = vmul.f32 0.0, %v1737_v0 }
 0x92b   :  { %v75_v19 = vmul.f32 %v74_v15, %v24_v16  ;;  %v76_v20 = vmul.f32 %v74_v15, %v25_v18  ;;  %v77_v32 = vmul.f32 %v74_v15, %v26_v25  ;;  %v78_v34 = vmul.f32 %v74_v15, %v27_v26 }
 0x92c   :  { %v1730_v60 = vrot.slane %v79_v55, %v1537_v17 }
 0x92d   :  { %v1418_v21 = vpack.c.bf16 %v76_v20, %v75_v19  ;;  %v1422_v42 = vpack.c.bf16 %v78_v34, %v77_v32 }
 0x92f   :  { %1419 = vmatprep.subr.bf16.mxu0 %v1418_v21 }
 0x9de   :  { %v754_v7 = vpop.f32.mrb[10].mxu1 }
 0x9df   :  { %v758_v10 = vadd.f32 %v754_v7, %v227_v6  ;;  %v1323_v11 = vpop.f32.mrb[11].mxu1 }
 0x9e1   :  { %v759_v13 = vadd.f32 %v758_v10, %v682_v8 }
 0x9e3   :  { %760 = vrot.lane.b32.xlu0 %v759_v13, %s1475_s13  ;;  %v771_v56 = vmul.f32 %v759_v13, %v1592_v39 }
 0xa55   :  { %v761_v22 = vpop.permute.xlu0 %760 }
 0xa56   :  { %v762_v23 = vadd.f32 %v761_v22, %v759_v13 }
 0xa58   :  { %763 = vrot.lane.b32.xlu1 %v762_v23, %s1476_s1 }
 0xaca   :  { %v764_v27 = vpop.permute.xlu1 %763 }
 0xacb   :  { %v765_v28 = vadd.f32 %v764_v27, %v762_v23 }
 0xacd   :  { %v767_v40 = vmul.f32 %v765_v28, %v1605_v54 }
 0xacf   :  { %v1710_v41 = vadd.f32 %v767_v40, %v766_v38  ;;  %v219_v40 = vadd.f32 %v1581_v35, %v1588_v37 }
 0xad1   :  { %770 = vst.msk [vmem:[#allocation3 + $0x28] sm:$0xff] %vm240_vm2, %v1710_v41  ;;  %1333 = vmatmul.mubr.msk.f32.vlgmr.msra.gmra.mrb[8].mxu0 %vm240_vm2, %v1710_v41  ;;  %v855_v28 = vmul.f32 %v1710_v41, %v1602_v53 }
 0xad2   :  { %1421 = vmatpush3.bf16.msra.mxu0 %v1418_v21  ;;  %1354 = vmatprep.mubr.msk.f32.mxu0 %vm240_vm2, %v949_v43 }
 0xad3   :  { %1423 = vmatprep.subr.bf16.mxu0 %v1422_v42 }
 0xad6   :  { %1425 = vmatpush3.bf16.msra.mxu0 %v1422_v42  ;;  %v229_v42 = vmul.f32 %v219_v40, %v1552_v24 }
 0xad8   :  { %v954_v48 = vld [vmem:[#allocation3 + $0x28] sm:$0xff] }
 0xad9   :  { %1355 = vmatmul.mubr.msk.f32.vlgmr.msra.gmra.mrb[10].mxu0 %vm240_vm2, %v950_v44 }
 0xada   :  { %1357 = vmatprep.mubr.msk.f32.mxu0 %vm240_vm2, %v951_v45 }
 0xadd   :  { %1358 = vmatmul.mubr.msk.f32.gmra.mrb[12].mxu0 %vm240_vm2, %v952_v46 }
 0xade   :  { %1360 = vmatprep.mubr.msk.f32.mxu0 %vm240_vm2, %v953_v47 }
 0xae1   :  { %1361 = vmatmul.mubr.msk.f32.gmra.mrb[14].mxu0 %vm240_vm2, %v954_v48 }
 0xba4   :  { %v843_v52 = vpop.f32.mrb[8].mxu0 }
 0xba5   :  { %v847_v57 = vadd.f32 %v843_v52, %v228_v51  ;;  %v1334_v58 = vpop.f32.mrb[9].mxu0 }
 0xba7   :  { %v848_v59 = vadd.f32 %v847_v57, %v771_v56 }
 0xba9   :  { %849 = vrot.lane.b32.xlu0 %v848_v59, %s1475_s13  ;;  %v860_v44 = vmul.f32 %v848_v59, %v1592_v39 }
 0xbac   :  { %v1356_v61 = vpop.f32.mrb[10].mxu0 }
 0xbad   :  { %v1057_v36 = vadd.f32 %v1356_v61, %v1730_v60  ;;  %v1051_v62 = vpop.f32.mrb[11].mxu0 }
 0xbae   :  { %v1052_v63 = vadd.f32 %v1051_v62, %v1730_v60 }
 0xbaf   :  { %1091 = vst.msk [vmem:[#allocation3 + $0x8] sm:$0xff] %vm240_vm2, %v1057_v36 }
 0xbb0   :  { %1090 = vst.msk [vmem:[#allocation3] sm:$0xff] %vm240_vm2, %v1052_v63  ;;  %v1359_v1 = vpop.f32.mrb[12].mxu0 }
 0xbb1   :  { %v1067_v2 = vadd.f32 %v1359_v1, %v1730_v60  ;;  %v1061_v3 = vpop.f32.mrb[13].mxu0 }
 0xbb2   :  { %v1062_v33 = vadd.f32 %v1061_v3, %v1730_v60 }
 0xbb3   :  { %1093 = vst.msk [vmem:[#allocation3 + $0x18] sm:$0xff] %vm240_vm2, %v1067_v2 }
 0xbb4   :  { %1092 = vst.msk [vmem:[#allocation3 + $0x10] sm:$0xff] %vm240_vm2, %v1062_v33  ;;  %v1362_v4 = vpop.f32.mrb[14].mxu0 }
 0xbb5   :  { %v1077_v6 = vadd.f32 %v1362_v4, %v1730_v60  ;;  %v1071_v7 = vpop.f32.mrb[15].mxu0 }
 0xbb6   :  { %v1072_v17 = vadd.f32 %v1071_v7, %v1730_v60  ;;  %v1103_v13 = vld [vmem:[#allocation3 + $0x8] sm:$0xff] }
 0xbb7   :  { %1095 = vst.msk [vmem:[#allocation3 + $0x28] sm:$0xff] %vm240_vm2, %v1077_v6  ;;  %v1099_v8 = vld [vmem:[#allocation3] sm:$0xff] }
 0xbb8   :  { %1094 = vst.msk [vmem:[#allocation3 + $0x20] sm:$0xff] %vm240_vm2, %v1072_v17  ;;  %v1100_v10 = vadd.f32 %v1099_v8, %v1098_v5 }
 0xbba   :  { %1101 = vst.msk [vmem:[#allocation4] sm:$0xff] %vm240_vm2, %v1100_v10  ;;  %v1102_v11 = vmul.f32 %v1100_v10, %v1737_v0  ;;  %v1113_v14 = vld [vmem:[#allocation3 + $0x18] sm:$0xff] }
 0xbbb   :  { %v1108_v29 = vld [vmem:[#allocation3 + $0x10] sm:$0xff] }
 0xbbc   :  { %v1104_v12 = vadd.f32 %v1103_v13, %v1102_v11 }
 0xbbe   :  { %1106 = vst.msk [vmem:[#allocation4 + $0x8] sm:$0xff] %vm240_vm2, %v1104_v12  ;;  %v1107_v9 = vmul.f32 %v1104_v12, %v1737_v0  ;;  %v1123_v21 = vld [vmem:[#allocation3 + $0x28] sm:$0xff] }
 0xbbf   :  { %v1118_v18 = vld [vmem:[#allocation3 + $0x20] sm:$0xff] }
 0xbc0   :  { %v1109_v30 = vadd.f32 %v1108_v29, %v1107_v9 }
 0xbc2   :  { %1111 = vst.msk [vmem:[#allocation4 + $0x10] sm:$0xff] %vm240_vm2, %v1109_v30  ;;  %v1112_v31 = vmul.f32 %v1109_v30, %v1737_v0 }
 0xbc4   :  { %v1114_v15 = vadd.f32 %v1113_v14, %v1112_v31 }
 0xbc6   :  { %1116 = vst.msk [vmem:[#allocation4 + $0x18] sm:$0xff] %vm240_vm2, %v1114_v15  ;;  %v1117_v16 = vmul.f32 %v1114_v15, %v1737_v0 }
 0xbc8   :  { %v1119_v19 = vadd.f32 %v1118_v18, %v1117_v16 }
 0xbca   :  { %1121 = vst.msk [vmem:[#allocation4 + $0x20] sm:$0xff] %vm240_vm2, %v1119_v19  ;;  %v1122_v20 = vmul.f32 %v1119_v19, %v1737_v0 }
 0xbcc   :  { %v1124_v22 = vadd.f32 %v1123_v21, %v1122_v20 }
 0xbce   :  { %1126 = vst.msk [vmem:[#allocation4 + $0x28] sm:$0xff] %vm240_vm2, %v1124_v22 }
 0xc1b   :  { %v850_v23 = vpop.permute.xlu0 %849 }
 0xc1c   :  { %v851_v25 = vadd.f32 %v850_v23, %v848_v59 }
 0xc1e   :  { %852 = vrot.lane.b32.xlu1 %v851_v25, %s1476_s1 }
 0xc90   :  { %v853_v26 = vpop.permute.xlu1 %852 }
 0xc91   :  { %v854_v27 = vadd.f32 %v853_v26, %v851_v25 }
 0xc93   :  { %v856_v32 = vmul.f32 %v854_v27, %v1605_v54 }
 0xc95   :  { %v857_v34 = vadd.f32 %v856_v32, %v855_v28 }
 0xc97   :  { %859 = vst.msk [vmem:[#allocation3 + $0x30] sm:$0xff] %vm240_vm2, %v857_v34  ;;  %1344 = vmatmul.mubr.msk.f32.vlgmr.msra.gmra.mrb[12].mxu1 %vm240_vm2, %v857_v34  ;;  %v944_v51 = vmul.f32 %v857_v34, %v1602_v53  ;;  %v1127_v53 = vmul.f32 %v1124_v22, %v1737_v0 }
 0xc9e   :  { %v955_v38 = vld [vmem:[#allocation3 + $0x30] sm:$0xff] }
 0xc9f   :  { %1363 = vmatprep.mubr.msk.f32.mxu0 %vm240_vm2, %v955_v38 }
 0xd6a   :  { %v932_v43 = vpop.f32.mrb[12].mxu1 }
 0xd6b   :  { %v936_v45 = vadd.f32 %v932_v43, %v229_v42  ;;  %v1345_v41 = vpop.f32.mrb[13].mxu1 }
 0xd6d   :  { %v937_v46 = vadd.f32 %v936_v45, %v860_v44 }
 0xd6f   :  { %938 = vrot.lane.b32.xlu0 %v937_v46, %s1475_s13 }
 0xde1   :  { %v939_v47 = vpop.permute.xlu0 %938 }
 0xde2   :  { %v940_v48 = vadd.f32 %v939_v47, %v937_v46 }
 0xde4   :  { %941 = vrot.lane.b32.xlu1 %v940_v48, %s1476_s1 }
 0xe56   :  { %v942_v49 = vpop.permute.xlu1 %941 }
 0xe57   :  { %v943_v50 = vadd.f32 %v942_v49, %v940_v48 }
 0xe59   :  { %v945_v35 = vmul.f32 %v943_v50, %v1605_v54 }
 0xe5b   :  { %v946_v37 = vadd.f32 %v945_v35, %v944_v51 }
 0xe5d   :  { %948 = vst.msk [vmem:[#allocation3 + $0x38] sm:$0xff] %vm240_vm2, %v946_v37 }
 0xe64   :  { %v956_v24 = vld [vmem:[#allocation3 + $0x38] sm:$0xff] }
 0xe65   :  { %1364 = vmatmul.mubr.msk.f32.gmra.mrb[16].mxu0 %vm240_vm2, %v956_v24 }
 0xf38   :  { %v1365_v39 = vpop.f32.mrb[16].mxu0 }
 0xf39   :  { %v1087_v52 = vadd.f32 %v1365_v39, %v1730_v60  ;;  %v1081_v55 = vpop.f32.mrb[17].mxu0 }
 0xf3a   :  { %v1082_v56 = vadd.f32 %v1081_v55, %v1730_v60 }
 0xf3b   :  { %1097 = vst.msk [vmem:[#allocation3 + $0x38] sm:$0xff] %vm240_vm2, %v1087_v52 }
 0xf3c   :  { %1096 = vst.msk [vmem:[#allocation3 + $0x30] sm:$0xff] %vm240_vm2, %v1082_v56 }
 0xf42   :  { %v1133_v59 = vld [vmem:[#allocation3 + $0x38] sm:$0xff] }
 0xf43   :  { %v1128_v57 = vld [vmem:[#allocation3 + $0x30] sm:$0xff] }
 0xf44   :  { %v1129_v54 = vadd.f32 %v1128_v57, %v1127_v53 }
 0xf46   :  { %1131 = vst.msk [vmem:[#allocation4 + $0x30] sm:$0xff] %vm240_vm2, %v1129_v54  ;;  %v1132_v58 = vmul.f32 %v1129_v54, %v1737_v0 }
 0xf48   :  { %v1134_v61 = vadd.f32 %v1133_v59, %v1132_v58 }
 0xf4a   :  { %1136 = vst.msk [vmem:[#allocation4 + $0x38] sm:$0xff] %vm240_vm2, %v1134_v61 }
 0xf4b   :  { %1459 = shalt.err (!%p1456_p4)
}
 0xf4c   :  { %s1460_s8 = scalar_lea.hbm %s1800_s3, 1024 }
 0xf4d   :  { %p1461_p5 = scmp.ne.s32.totalorder %s1800_s3, %s1460_s8  ;;  %p1464_p6 = scmp.lt.u32.totalorder %s1460_s8, %s1800_s3 }
 0xf4f   :  { %p1466_p7 = pnand %p1464_p6, %p1461_p5 }
 0xf51   :  { %1469 = shalt.err (!%p1466_p7)
}
 0xf52   :  { %s1478_s13 = smov 128   ;;  %s1479_s1 = smov 8  }
 0xf53   :  { %1148 = dma.vmem_to_hbm [thread:$0]  %s1143_s4, 1024, %s1800_s3, [#allocation5], %s1478_s13, %s1478_s13, %s1479_s1  }
 0xf54   :  { %1470 = dma.done.wait [#allocation5], 1024  }
 0xf55   :  { %1471 = vsyncadd [#allocation5], 4294966272 }
 0xf56   :  { %1152 = vsyncpa [#allocation5], 1 }

</bundles_post_ra>
